<compile_context>
chip_gen: v7x
topology: tpu7x:2x2x1
jax: 0.10.0
libtpu: 0.0.40
codegen_flags: <defaults>
</compile_context>

<pallas_src>
import functools

import jax
import jax.numpy as jnp
import numpy as np
from jax.experimental import pallas as pl
from jax.experimental.pallas import tpu as pltpu

EPS = 0.8          # nn.BatchNorm1d(out_features, 0.8) -> eps=0.8
NEG_SLOPE = 0.2    # LeakyReLU(0.2)
LANE = 128         # TPU lane width


def _round_up(n, m):
    return ((n + m - 1) // m) * m


def _vmem_limit_bytes():
    """Size the VMEM request from the actual chip, leaving ~25% headroom."""
    try:
        cap = int(pltpu.get_tpu_info().vmem_capacity_bytes)
    except Exception:
        cap = 64 << 20  # conservative fallback (v7x per-TC VMEM)
    return max(16 << 20, min((cap * 3) // 4, 96 << 20))


_VMEM_LIMIT = _vmem_limit_bytes()


def _leaky_relu(x):
    return jnp.where(x > 0, x, NEG_SLOPE * x)


def _pick_tile(n_pad):
    # 256-wide output tiles feed the v6e/v7x 256x256 MXUs; fall back to 128.
    return 256 if n_pad % 256 == 0 else 128


# ---------------------------------------------------------------------------
# Kernels (one grid step = one output-feature slab, full batch resident)
# ---------------------------------------------------------------------------

def _linear_act_kernel(x_ref, w_ref, b_ref, out_ref, *, act):
    # x: (B, K) bf16, w: (K, tn) bf16, b: (1, tn) f32 -> out: (B, tn)
    h = jnp.dot(x_ref[...], w_ref[...], preferred_element_type=jnp.float32)
    h = h + b_ref[...]
    if act == "leaky_relu":
        h = _leaky_relu(h)
    elif act == "tanh":
        h = jnp.tanh(h)
    out_ref[...] = h.astype(out_ref.dtype)


def _linear_bn_lrelu_kernel(x_ref, w_ref, b_ref, g_ref, be_ref, out_ref):
    # Linear -> training-mode BatchNorm1d (full-batch stats, exact because the
    # whole batch is present for this feature slab) -> LeakyReLU.
    h = jnp.dot(x_ref[...], w_ref[...], preferred_element_type=jnp.float32)
    h = h + b_ref[...]
    mean = jnp.mean(h, axis=0, keepdims=True)
    var = jnp.mean(h * h, axis=0, keepdims=True) - mean * mean  # biased var
    scale = g_ref[...] * jax.lax.rsqrt(var + EPS)
    shift = be_ref[...] - mean * scale
    h = _leaky_relu(h * scale + shift)
    out_ref[...] = h.astype(out_ref.dtype)


# ---------------------------------------------------------------------------
# Per-layer pallas_call wrapper
# ---------------------------------------------------------------------------

def _layer_call(x, w, b, gamma=None, beta=None, *, act="leaky_relu",
                out_dtype=jnp.bfloat16):
    B, K = x.shape
    Kw, N = w.shape
    assert K == Kw, (K, Kw)
    tn = _pick_tile(N)
    grid = (N // tn,)

    x_spec = pl.BlockSpec((B, K), lambda j: (0, 0))      # resident across slabs
    w_spec = pl.BlockSpec((K, tn), lambda j: (0, j))     # pipelined weight slab
    vec_spec = pl.BlockSpec((1, tn), lambda j: (0, j))
    out_spec = pl.BlockSpec((B, tn), lambda j: (0, j))   # lane-dense store

    cparams = pltpu.CompilerParams(
        dimension_semantics=("parallel",),               # megacore-shardable
        vmem_limit_bytes=_VMEM_LIMIT,
    )

    if gamma is None:
        return pl.pallas_call(
            functools.partial(_linear_act_kernel, act=act),
            grid=grid,
            in_specs=[x_spec, w_spec, vec_spec],
            out_specs=out_spec,
            out_shape=jax.ShapeDtypeStruct((B, N), out_dtype),
            compiler_params=cparams,
        )(x, w, b)

    return pl.pallas_call(
        _linear_bn_lrelu_kernel,
        grid=grid,
        in_specs=[x_spec, w_spec, vec_spec, vec_spec, vec_spec],
        out_specs=out_spec,
        out_shape=jax.ShapeDtypeStruct((B, N), out_dtype),
        compiler_params=cparams,
    )(x, w, b, gamma, beta)


# ---------------------------------------------------------------------------
# Parameters
# ---------------------------------------------------------------------------

def init_generator_params(key, latent_size, img_shape, hidden_size=128):
    """Matches PyTorch Linear default init ranges. Weights stored transposed
    as (in_features, out_features); vectors as (1, out_features)."""
    out_dim = int(np.prod(img_shape))
    dims = [
        (latent_size, hidden_size, False),
        (hidden_size, hidden_size * 2, True),
        (hidden_size * 2, hidden_size * 4, True),
        (hidden_size * 4, hidden_size * 8, True),
        (hidden_size * 8, out_dim, False),   # last linear: no BN
    ]
    params = []
    for (fan_in, fan_out, has_bn) in dims:
        key, kw, kb = jax.random.split(key, 3)
        bound = 1.0 / np.sqrt(fan_in)
        w = jax.random.uniform(kw, (fan_in, fan_out), jnp.float32, -bound, bound)
        b = jax.random.uniform(kb, (1, fan_out), jnp.float32, -bound, bound)
        layer = {"w": w, "b": b}
        if has_bn:
            layer["gamma"] = jnp.ones((1, fan_out), jnp.float32)
            layer["beta"] = jnp.zeros((1, fan_out), jnp.float32)
        params.append(layer)
    return params


def pack_params_for_kernel(params):
    """Zero-pad every feature width to a multiple of 128 lanes and cast the
    matmul operands (weights) to bf16. Padding is inert: padded weight rows /
    cols and biases are zero, gamma=1 / beta=0 on padded columns."""
    packed = []
    for layer in params:
        fan_in, fan_out = layer["w"].shape
        kp, npad = _round_up(fan_in, LANE), _round_up(fan_out, LANE)
        w = (jnp.zeros((kp, npad), jnp.float32)
             .at[:fan_in, :fan_out].set(layer["w"])).astype(jnp.bfloat16)
        b = jnp.zeros((1, npad), jnp.float32).at[:, :fan_out].set(layer["b"])
        pk = {"w": w, "b": b}
        if "gamma" in layer:
            pk["gamma"] = (jnp.ones((1, npad), jnp.float32)
                           .at[:, :fan_out].set(layer["gamma"]))
            pk["beta"] = (jnp.zeros((1, npad), jnp.float32)
                          .at[:, :fan_out].set(layer["beta"]))
        packed.append(pk)
    return packed


# ---------------------------------------------------------------------------
# Forward
# ---------------------------------------------------------------------------

@functools.partial(jax.jit, static_argnames=("img_shape",))
def generator_forward(x, packed_params, img_shape):
    B, K = x.shape
    out_dim = int(np.prod(img_shape))

    # Pad the latent dim to a lane multiple and cast to bf16 for the MXU.
    kp = packed_params[0]["w"].shape[0]
    xp = (jnp.zeros((B, kp), jnp.float32).at[:, :K].set(x)).astype(jnp.bfloat16)

    # Block 1: Linear -> LeakyReLU (no norm)
    h = _layer_call(xp, packed_params[0]["w"], packed_params[0]["b"],
                    act="leaky_relu", out_dtype=jnp.bfloat16)
    # Blocks 2-4: Linear -> BatchNorm1d(train) -> LeakyReLU
    for i in (1, 2, 3):
        p = packed_params[i]
        h = _layer_call(h, p["w"], p["b"], p["gamma"], p["beta"],
                        out_dtype=jnp.bfloat16)
    # Head: Linear -> Tanh
    p = packed_params[4]
    h = _layer_call(h, p["w"], p["b"], act="tanh", out_dtype=jnp.float32)

    # Glue: drop lane padding and reshape to (B, *img_shape) = NCHW.
    return h[:, :out_dim].reshape((B,) + tuple(img_shape))


# ---------------------------------------------------------------------------
# References for correctness checks
# ---------------------------------------------------------------------------

def _bn_train_f32(x, gamma, beta):
    mean = jnp.mean(x, axis=0, keepdims=True)
    var = jnp.mean((x - mean) * (x - mean), axis=0, keepdims=True)
    return (x - mean) * jax.lax.rsqrt(var + EPS) * gamma + beta


def _reference_forward_f32(x, params):
    """Pure-f32 JAX replica of the PyTorch math."""
    h = _leaky_relu(x @ params[0]["w"] + params[0]["b"])
    for i in (1, 2, 3):
        h = h @ params[i]["w"] + params[i]["b"]
        h = _leaky_relu(_bn_train_f32(h, params[i]["gamma"], params[i]["beta"]))
    return jnp.tanh(h @ params[4]["w"] + params[4]["b"])


def _reference_forward_bf16(x, packed_params, out_dim):
    """Same bf16-operand / f32-accumulate math as the kernels (tight check)."""
    B, K = x.shape
    kp = packed_params[0]["w"].shape[0]
    h = (jnp.zeros((B, kp), jnp.float32).at[:, :K].set(x)).astype(jnp.bfloat16)

    def dot(a, w):
        return jnp.dot(a, w, preferred_element_type=jnp.float32)

    p = packed_params[0]
    h = _leaky_relu(dot(h, p["w"]) + p["b"]).astype(jnp.bfloat16)
    for i in (1, 2, 3):
        p = packed_params[i]
        z = dot(h, p["w"]) + p["b"]
        mean = jnp.mean(z, axis=0, keepdims=True)
        var = jnp.mean(z * z, axis=0, keepdims=True) - mean * mean
        scale = p["gamma"] * jax.lax.rsqrt(var + EPS)
        shift = p["beta"] - mean * scale
        h = _leaky_relu(z * scale + shift).astype(jnp.bfloat16)
    p = packed_params[4]
    return jnp.tanh(dot(h, p["w"]) + p["b"])[:, :out_dim]


if __name__ == "__main__":
    # Small, shape-consistent configuration.
    latent_size = 32
    hidden_size = 32               # -> feature widths 32, 64, 128, 256
    img_shape = (1, 16, 16)        # prod = 256
    batch = 8

    key = jax.random.PRNGKey(0)
    key_x, key_p = jax.random.split(key)
    x = jax.random.normal(key_x, (batch, latent_size), jnp.float32)
    params = init_generator_params(key_p, latent_size, img_shape, hidden_size)
    packed = pack_params_for_kernel(params)

    img = generator_forward(x, packed, img_shape)
    img = jax.block_until_ready(img)
    assert img.shape == (batch,) + img_shape, img.shape

    # Tight check: kernel vs a pure-JAX reference using identical bf16 math.
    ref_bf16 = _reference_forward_bf16(x, packed, int(np.prod(img_shape)))
    ref_bf16 = np.asarray(ref_bf16).reshape((batch,) + img_shape)
    np.testing.assert_allclose(np.asarray(img), ref_bf16, atol=2e-3, rtol=2e-3)

    # Loose check: kernel vs the full-precision PyTorch-equivalent math.
    ref_f32 = np.asarray(_reference_forward_f32(x, params)).reshape(
        (batch,) + img_shape)
    np.testing.assert_allclose(np.asarray(img), ref_f32, atol=1e-1, rtol=1e-1)

    print("KERNEL_OK")
</pallas_src>

<mosaic_0001>
module attributes {stable_mosaic.version = 11 : i64} {
  func.func @_linear_act_kernel(%arg0: i32, %arg1: memref<8x128xbf16, #tpu.memory_space<vmem>>, %arg2: memref<128x128xbf16, #tpu.memory_space<vmem>>, %arg3: memref<1x128xf32, #tpu.memory_space<vmem>>, %arg4: memref<8x128xbf16, #tpu.memory_space<vmem>>) attributes {dimension_semantics = [#tpu.dimension_semantics<parallel>], iteration_bounds = array<i64: 1>, scalar_prefetch = 0 : i64, scratch_operands = 0 : i64, tpu.core_type = #tpu.core_type<tc>, window_params = [{pipeline_mode = #tpu.pipeline_mode<synchronous>, transform_indices = @transform_0, window_bounds = array<i64: 8, 128>}, {transform_indices = @transform_1, window_bounds = array<i64: 128, 128>}, {transform_indices = @transform_2, window_bounds = array<i64: 1, 128>}, {transform_indices = @transform_3, window_bounds = array<i64: 8, 128>}]} {
    %c0 = arith.constant 0 : index
    %c0_0 = arith.constant 0 : index
    %0 = vector.load %arg1[%c0, %c0_0] : memref<8x128xbf16, #tpu.memory_space<vmem>>, vector<8x128xbf16>
    %c0_1 = arith.constant 0 : index
    %c0_2 = arith.constant 0 : index
    %1 = vector.load %arg2[%c0_1, %c0_2] : memref<128x128xbf16, #tpu.memory_space<vmem>>, vector<128x128xbf16>
    %cst = arith.constant dense<0.000000e+00> : vector<8x128xf32>
    %2 = tpu.matmul %0, %1, %cst {dimension_numbers = #tpu.dot_dimension_numbers<[1], [0], [0], [1], [0, 0, 1, 1], [], []>} : vector<8x128xbf16>, vector<128x128xbf16>, vector<8x128xf32> -> vector<8x128xf32>
    %c0_3 = arith.constant 0 : index
    %c0_4 = arith.constant 0 : index
    %3 = vector.load %arg3[%c0_3, %c0_4] : memref<1x128xf32, #tpu.memory_space<vmem>>, vector<1x128xf32>
    %4 = vector.broadcast %3 : vector<1x128xf32> to vector<8x128xf32>
    %5 = arith.addf %2, %4 : vector<8x128xf32>
    %cst_5 = arith.constant 0.000000e+00 : f32
    %6 = vector.broadcast %cst_5 : f32 to vector<8x128xf32>
    %7 = arith.cmpf ogt, %5, %6 : vector<8x128xf32>
    %cst_6 = arith.constant 2.000000e-01 : f32
    %8 = vector.broadcast %cst_6 : f32 to vector<8x128xf32>
    %9 = arith.mulf %8, %5 : vector<8x128xf32>
    %10 = arith.select %7, %5, %9 : vector<8x128xi1>, vector<8x128xf32>
    %11 = arith.truncf %10 : vector<8x128xf32> to vector<8x128xbf16>
    %c0_7 = arith.constant 0 : index
    %c0_8 = arith.constant 0 : index
    %12 = vector.load %arg4[%c0_7, %c0_8] : memref<8x128xbf16, #tpu.memory_space<vmem>>, vector<8x128xbf16>
    tpu.vector_store %arg4[%c0_7, %c0_8], %11 {strides = array<i32>} : memref<8x128xbf16, #tpu.memory_space<vmem>>, vector<8x128xbf16>,
    return
  }
  func.func @transform_0(%arg0: i32) -> (i32, i32) {
    %c0_i32 = arith.constant 0 : i32
    %c0_i32_0 = arith.constant 0 : i32
    %c0_i32_1 = arith.constant 0 : i32
    return %c0_i32, %c0_i32_0 : i32, i32
  }
  func.func @transform_1(%arg0: i32) -> (i32, i32) {
    %c0_i32 = arith.constant 0 : i32
    %c0_i32_0 = arith.constant 0 : i32
    return %c0_i32, %arg0 : i32, i32
  }
  func.func @transform_2(%arg0: i32) -> (i32, i32) {
    %c0_i32 = arith.constant 0 : i32
    %c0_i32_0 = arith.constant 0 : i32
    return %c0_i32, %arg0 : i32, i32
  }
  func.func @transform_3(%arg0: i32) -> (i32, i32) {
    %c0_i32 = arith.constant 0 : i32
    %c0_i32_0 = arith.constant 0 : i32
    return %c0_i32, %arg0 : i32, i32
  }
}

module attributes {stable_mosaic.version = 11 : i64} {
  func.func @_linear_bn_lrelu_kernel(%arg0: i32, %arg1: memref<8x128xbf16, #tpu.memory_space<vmem>>, %arg2: memref<128x128xbf16, #tpu.memory_space<vmem>>, %arg3: memref<1x128xf32, #tpu.memory_space<vmem>>, %arg4: memref<1x128xf32, #tpu.memory_space<vmem>>, %arg5: memref<1x128xf32, #tpu.memory_space<vmem>>, %arg6: memref<8x128xbf16, #tpu.memory_space<vmem>>) attributes {dimension_semantics = [#tpu.dimension_semantics<parallel>], iteration_bounds = array<i64: 1>, scalar_prefetch = 0 : i64, scratch_operands = 0 : i64, tpu.core_type = #tpu.core_type<tc>, window_params = [{pipeline_mode = #tpu.pipeline_mode<synchronous>, transform_indices = @transform_0, window_bounds = array<i64: 8, 128>}, {transform_indices = @transform_1, window_bounds = array<i64: 128, 128>}, {transform_indices = @transform_2, window_bounds = array<i64: 1, 128>}, {transform_indices = @transform_3, window_bounds = array<i64: 1, 128>}, {transform_indices = @transform_4, window_bounds = array<i64: 1, 128>}, {transform_indices = @transform_5, window_bounds = array<i64: 8, 128>}]} {
    %c0 = arith.constant 0 : index
    %c0_0 = arith.constant 0 : index
    %0 = vector.load %arg1[%c0, %c0_0] : memref<8x128xbf16, #tpu.memory_space<vmem>>, vector<8x128xbf16>
    %c0_1 = arith.constant 0 : index
    %c0_2 = arith.constant 0 : index
    %1 = vector.load %arg2[%c0_1, %c0_2] : memref<128x128xbf16, #tpu.memory_space<vmem>>, vector<128x128xbf16>
    %cst = arith.constant dense<0.000000e+00> : vector<8x128xf32>
    %2 = tpu.matmul %0, %1, %cst {dimension_numbers = #tpu.dot_dimension_numbers<[1], [0], [0], [1], [0, 0, 1, 1], [], []>} : vector<8x128xbf16>, vector<128x128xbf16>, vector<8x128xf32> -> vector<8x128xf32>
    %c0_3 = arith.constant 0 : index
    %c0_4 = arith.constant 0 : index
    %3 = vector.load %arg3[%c0_3, %c0_4] : memref<1x128xf32, #tpu.memory_space<vmem>>, vector<1x128xf32>
    %4 = vector.broadcast %3 : vector<1x128xf32> to vector<8x128xf32>
    %5 = arith.addf %2, %4 : vector<8x128xf32>
    %cst_5 = arith.constant dense<0.000000e+00> : vector<128xf32>
    %6 = vector.multi_reduction <add>, %5, %cst_5 [0] : vector<8x128xf32> to vector<128xf32>
    %7 = vector.shape_cast %6 : vector<128xf32> to vector<1x128xf32>
    %cst_6 = arith.constant 8.000000e+00 : f32
    %8 = vector.broadcast %cst_6 : f32 to vector<1x128xf32>
    %9 = arith.divf %7, %8 : vector<1x128xf32>
    %10 = arith.mulf %5, %5 : vector<8x128xf32>
    %cst_7 = arith.constant dense<0.000000e+00> : vector<128xf32>
    %11 = vector.multi_reduction <add>, %10, %cst_7 [0] : vector<8x128xf32> to vector<128xf32>
    %12 = vector.shape_cast %11 : vector<128xf32> to vector<1x128xf32>
    %cst_8 = arith.constant 8.000000e+00 : f32
    %13 = vector.broadcast %cst_8 : f32 to vector<1x128xf32>
    %14 = arith.divf %12, %13 : vector<1x128xf32>
    %15 = arith.mulf %9, %9 : vector<1x128xf32>
    %16 = arith.subf %14, %15 : vector<1x128xf32>
    %c0_9 = arith.constant 0 : index
    %c0_10 = arith.constant 0 : index
    %17 = vector.load %arg4[%c0_9, %c0_10] : memref<1x128xf32, #tpu.memory_space<vmem>>, vector<1x128xf32>
    %cst_11 = arith.constant 8.000000e-01 : f32
    %18 = vector.broadcast %cst_11 : f32 to vector<1x128xf32>
    %19 = arith.addf %16, %18 : vector<1x128xf32>
    %20 = math.rsqrt %19 : vector<1x128xf32>
    %21 = arith.mulf %17, %20 : vector<1x128xf32>
    %c0_12 = arith.constant 0 : index
    %c0_13 = arith.constant 0 : index
    %22 = vector.load %arg5[%c0_12, %c0_13] : memref<1x128xf32, #tpu.memory_space<vmem>>, vector<1x128xf32>
    %23 = arith.mulf %9, %21 : vector<1x128xf32>
    %24 = arith.subf %22, %23 : vector<1x128xf32>
    %25 = vector.broadcast %21 : vector<1x128xf32> to vector<8x128xf32>
    %26 = arith.mulf %5, %25 : vector<8x128xf32>
    %27 = vector.broadcast %24 : vector<1x128xf32> to vector<8x128xf32>
    %28 = arith.addf %26, %27 : vector<8x128xf32>
    %cst_14 = arith.constant 0.000000e+00 : f32
    %29 = vector.broadcast %cst_14 : f32 to vector<8x128xf32>
    %30 = arith.cmpf ogt, %28, %29 : vector<8x128xf32>
    %cst_15 = arith.constant 2.000000e-01 : f32
    %31 = vector.broadcast %cst_15 : f32 to vector<8x128xf32>
    %32 = arith.mulf %31, %28 : vector<8x128xf32>
    %33 = arith.select %30, %28, %32 : vector<8x128xi1>, vector<8x128xf32>
    %34 = arith.truncf %33 : vector<8x128xf32> to vector<8x128xbf16>
    %c0_16 = arith.constant 0 : index
    %c0_17 = arith.constant 0 : index
    %35 = vector.load %arg6[%c0_16, %c0_17] : memref<8x128xbf16, #tpu.memory_space<vmem>>, vector<8x128xbf16>
    tpu.vector_store %arg6[%c0_16, %c0_17], %34 {strides = array<i32>} : memref<8x128xbf16, #tpu.memory_space<vmem>>, vector<8x128xbf16>,
    return
  }
  func.func @transform_0(%arg0: i32) -> (i32, i32) {
    %c0_i32 = arith.constant 0 : i32
    %c0_i32_0 = arith.constant 0 : i32
    %c0_i32_1 = arith.constant 0 : i32
    return %c0_i32, %c0_i32_0 : i32, i32
  }
  func.func @transform_1(%arg0: i32) -> (i32, i32) {
    %c0_i32 = arith.constant 0 : i32
    %c0_i32_0 = arith.constant 0 : i32
    return %c0_i32, %arg0 : i32, i32
  }
  func.func @transform_2(%arg0: i32) -> (i32, i32) {
    %c0_i32 = arith.constant 0 : i32
    %c0_i32_0 = arith.constant 0 : i32
    return %c0_i32, %arg0 : i32, i32
  }
  func.func @transform_3(%arg0: i32) -> (i32, i32) {
    %c0_i32 = arith.constant 0 : i32
    %c0_i32_0 = arith.constant 0 : i32
    return %c0_i32, %arg0 : i32, i32
  }
  func.func @transform_4(%arg0: i32) -> (i32, i32) {
    %c0_i32 = arith.constant 0 : i32
    %c0_i32_0 = arith.constant 0 : i32
    return %c0_i32, %arg0 : i32, i32
  }
  func.func @transform_5(%arg0: i32) -> (i32, i32) {
    %c0_i32 = arith.constant 0 : i32
    %c0_i32_0 = arith.constant 0 : i32
    return %c0_i32, %arg0 : i32, i32
  }
}

module attributes {stable_mosaic.version = 11 : i64} {
  func.func @_linear_bn_lrelu_kernel(%arg0: i32, %arg1: memref<8x128xbf16, #tpu.memory_space<vmem>>, %arg2: memref<128x256xbf16, #tpu.memory_space<vmem>>, %arg3: memref<1x256xf32, #tpu.memory_space<vmem>>, %arg4: memref<1x256xf32, #tpu.memory_space<vmem>>, %arg5: memref<1x256xf32, #tpu.memory_space<vmem>>, %arg6: memref<8x256xbf16, #tpu.memory_space<vmem>>) attributes {dimension_semantics = [#tpu.dimension_semantics<parallel>], iteration_bounds = array<i64: 1>, scalar_prefetch = 0 : i64, scratch_operands = 0 : i64, tpu.core_type = #tpu.core_type<tc>, window_params = [{pipeline_mode = #tpu.pipeline_mode<synchronous>, transform_indices = @transform_0, window_bounds = array<i64: 8, 128>}, {transform_indices = @transform_1, window_bounds = array<i64: 128, 256>}, {transform_indices = @transform_2, window_bounds = array<i64: 1, 256>}, {transform_indices = @transform_3, window_bounds = array<i64: 1, 256>}, {transform_indices = @transform_4, window_bounds = array<i64: 1, 256>}, {transform_indices = @transform_5, window_bounds = array<i64: 8, 256>}]} {
    %c0 = arith.constant 0 : index
    %c0_0 = arith.constant 0 : index
    %0 = vector.load %arg1[%c0, %c0_0] : memref<8x128xbf16, #tpu.memory_space<vmem>>, vector<8x128xbf16>
    %c0_1 = arith.constant 0 : index
    %c0_2 = arith.constant 0 : index
    %1 = vector.load %arg2[%c0_1, %c0_2] : memref<128x256xbf16, #tpu.memory_space<vmem>>, vector<128x256xbf16>
    %cst = arith.constant dense<0.000000e+00> : vector<8x256xf32>
    %2 = tpu.matmul %0, %1, %cst {dimension_numbers = #tpu.dot_dimension_numbers<[1], [0], [0], [1], [0, 0, 1, 1], [], []>} : vector<8x128xbf16>, vector<128x256xbf16>, vector<8x256xf32> -> vector<8x256xf32>
    %c0_3 = arith.constant 0 : index
    %c0_4 = arith.constant 0 : index
    %3 = vector.load %arg3[%c0_3, %c0_4] : memref<1x256xf32, #tpu.memory_space<vmem>>, vector<1x256xf32>
    %4 = vector.broadcast %3 : vector<1x256xf32> to vector<8x256xf32>
    %5 = arith.addf %2, %4 : vector<8x256xf32>
    %cst_5 = arith.constant dense<0.000000e+00> : vector<256xf32>
    %6 = vector.multi_reduction <add>, %5, %cst_5 [0] : vector<8x256xf32> to vector<256xf32>
    %7 = vector.shape_cast %6 : vector<256xf32> to vector<1x256xf32>
    %cst_6 = arith.constant 8.000000e+00 : f32
    %8 = vector.broadcast %cst_6 : f32 to vector<1x256xf32>
    %9 = arith.divf %7, %8 : vector<1x256xf32>
    %10 = arith.mulf %5, %5 : vector<8x256xf32>
    %cst_7 = arith.constant dense<0.000000e+00> : vector<256xf32>
    %11 = vector.multi_reduction <add>, %10, %cst_7 [0] : vector<8x256xf32> to vector<256xf32>
    %12 = vector.shape_cast %11 : vector<256xf32> to vector<1x256xf32>
    %cst_8 = arith.constant 8.000000e+00 : f32
    %13 = vector.broadcast %cst_8 : f32 to vector<1x256xf32>
    %14 = arith.divf %12, %13 : vector<1x256xf32>
    %15 = arith.mulf %9, %9 : vector<1x256xf32>
    %16 = arith.subf %14, %15 : vector<1x256xf32>
    %c0_9 = arith.constant 0 : index
    %c0_10 = arith.constant 0 : index
    %17 = vector.load %arg4[%c0_9, %c0_10] : memref<1x256xf32, #tpu.memory_space<vmem>>, vector<1x256xf32>
    %cst_11 = arith.constant 8.000000e-01 : f32
    %18 = vector.broadcast %cst_11 : f32 to vector<1x256xf32>
    %19 = arith.addf %16, %18 : vector<1x256xf32>
    %20 = math.rsqrt %19 : vector<1x256xf32>
    %21 = arith.mulf %17, %20 : vector<1x256xf32>
    %c0_12 = arith.constant 0 : index
    %c0_13 = arith.constant 0 : index
    %22 = vector.load %arg5[%c0_12, %c0_13] : memref<1x256xf32, #tpu.memory_space<vmem>>, vector<1x256xf32>
    %23 = arith.mulf %9, %21 : vector<1x256xf32>
    %24 = arith.subf %22, %23 : vector<1x256xf32>
    %25 = vector.broadcast %21 : vector<1x256xf32> to vector<8x256xf32>
    %26 = arith.mulf %5, %25 : vector<8x256xf32>
    %27 = vector.broadcast %24 : vector<1x256xf32> to vector<8x256xf32>
    %28 = arith.addf %26, %27 : vector<8x256xf32>
    %cst_14 = arith.constant 0.000000e+00 : f32
    %29 = vector.broadcast %cst_14 : f32 to vector<8x256xf32>
    %30 = arith.cmpf ogt, %28, %29 : vector<8x256xf32>
    %cst_15 = arith.constant 2.000000e-01 : f32
    %31 = vector.broadcast %cst_15 : f32 to vector<8x256xf32>
    %32 = arith.mulf %31, %28 : vector<8x256xf32>
    %33 = arith.select %30, %28, %32 : vector<8x256xi1>, vector<8x256xf32>
    %34 = arith.truncf %33 : vector<8x256xf32> to vector<8x256xbf16>
    %c0_16 = arith.constant 0 : index
    %c0_17 = arith.constant 0 : index
    %35 = vector.load %arg6[%c0_16, %c0_17] : memref<8x256xbf16, #tpu.memory_space<vmem>>, vector<8x256xbf16>
    tpu.vector_store %arg6[%c0_16, %c0_17], %34 {strides = array<i32>} : memref<8x256xbf16, #tpu.memory_space<vmem>>, vector<8x256xbf16>,
    return
  }
  func.func @transform_0(%arg0: i32) -> (i32, i32) {
    %c0_i32 = arith.constant 0 : i32
    %c0_i32_0 = arith.constant 0 : i32
    %c0_i32_1 = arith.constant 0 : i32
    return %c0_i32, %c0_i32_0 : i32, i32
  }
  func.func @transform_1(%arg0: i32) -> (i32, i32) {
    %c0_i32 = arith.constant 0 : i32
    %c0_i32_0 = arith.constant 0 : i32
    return %c0_i32, %arg0 : i32, i32
  }
  func.func @transform_2(%arg0: i32) -> (i32, i32) {
    %c0_i32 = arith.constant 0 : i32
    %c0_i32_0 = arith.constant 0 : i32
    return %c0_i32, %arg0 : i32, i32
  }
  func.func @transform_3(%arg0: i32) -> (i32, i32) {
    %c0_i32 = arith.constant 0 : i32
    %c0_i32_0 = arith.constant 0 : i32
    return %c0_i32, %arg0 : i32, i32
  }
  func.func @transform_4(%arg0: i32) -> (i32, i32) {
    %c0_i32 = arith.constant 0 : i32
    %c0_i32_0 = arith.constant 0 : i32
    return %c0_i32, %arg0 : i32, i32
  }
  func.func @transform_5(%arg0: i32) -> (i32, i32) {
    %c0_i32 = arith.constant 0 : i32
    %c0_i32_0 = arith.constant 0 : i32
    return %c0_i32, %arg0 : i32, i32
  }
}

module attributes {stable_mosaic.version = 11 : i64} {
  func.func @_linear_act_kernel(%arg0: i32, %arg1: memref<8x256xbf16, #tpu.memory_space<vmem>>, %arg2: memref<256x256xbf16, #tpu.memory_space<vmem>>, %arg3: memref<1x256xf32, #tpu.memory_space<vmem>>, %arg4: memref<8x256xf32, #tpu.memory_space<vmem>>) attributes {dimension_semantics = [#tpu.dimension_semantics<parallel>], iteration_bounds = array<i64: 1>, scalar_prefetch = 0 : i64, scratch_operands = 0 : i64, tpu.core_type = #tpu.core_type<tc>, window_params = [{pipeline_mode = #tpu.pipeline_mode<synchronous>, transform_indices = @transform_0, window_bounds = array<i64: 8, 256>}, {transform_indices = @transform_1, window_bounds = array<i64: 256, 256>}, {transform_indices = @transform_2, window_bounds = array<i64: 1, 256>}, {transform_indices = @transform_3, window_bounds = array<i64: 8, 256>}]} {
    %c0 = arith.constant 0 : index
    %c0_0 = arith.constant 0 : index
    %0 = vector.load %arg1[%c0, %c0_0] : memref<8x256xbf16, #tpu.memory_space<vmem>>, vector<8x256xbf16>
    %c0_1 = arith.constant 0 : index
    %c0_2 = arith.constant 0 : index
    %1 = vector.load %arg2[%c0_1, %c0_2] : memref<256x256xbf16, #tpu.memory_space<vmem>>, vector<256x256xbf16>
    %cst = arith.constant dense<0.000000e+00> : vector<8x256xf32>
    %2 = tpu.matmul %0, %1, %cst {dimension_numbers = #tpu.dot_dimension_numbers<[1], [0], [0], [1], [0, 0, 1, 1], [], []>} : vector<8x256xbf16>, vector<256x256xbf16>, vector<8x256xf32> -> vector<8x256xf32>
    %c0_3 = arith.constant 0 : index
    %c0_4 = arith.constant 0 : index
    %3 = vector.load %arg3[%c0_3, %c0_4] : memref<1x256xf32, #tpu.memory_space<vmem>>, vector<1x256xf32>
    %4 = vector.broadcast %3 : vector<1x256xf32> to vector<8x256xf32>
    %5 = arith.addf %2, %4 : vector<8x256xf32>
    %6 = math.tanh %5 : vector<8x256xf32>
    %c0_5 = arith.constant 0 : index
    %c0_6 = arith.constant 0 : index
    %7 = vector.load %arg4[%c0_5, %c0_6] : memref<8x256xf32, #tpu.memory_space<vmem>>, vector<8x256xf32>
    tpu.vector_store %arg4[%c0_5, %c0_6], %6 {strides = array<i32>} : memref<8x256xf32, #tpu.memory_space<vmem>>, vector<8x256xf32>,
    return
  }
  func.func @transform_0(%arg0: i32) -> (i32, i32) {
    %c0_i32 = arith.constant 0 : i32
    %c0_i32_0 = arith.constant 0 : i32
    %c0_i32_1 = arith.constant 0 : i32
    return %c0_i32, %c0_i32_0 : i32, i32
  }
  func.func @transform_1(%arg0: i32) -> (i32, i32) {
    %c0_i32 = arith.constant 0 : i32
    %c0_i32_0 = arith.constant 0 : i32
    return %c0_i32, %arg0 : i32, i32
  }
  func.func @transform_2(%arg0: i32) -> (i32, i32) {
    %c0_i32 = arith.constant 0 : i32
    %c0_i32_0 = arith.constant 0 : i32
    return %c0_i32, %arg0 : i32, i32
  }
  func.func @transform_3(%arg0: i32) -> (i32, i32) {
    %c0_i32 = arith.constant 0 : i32
    %c0_i32_0 = arith.constant 0 : i32
    return %c0_i32, %arg0 : i32, i32
  }
}

</mosaic_0001>

<bundles_post_ra>
// kernel: generator_forward.5
= control target key start
LH: loop header
LB: loop body
LE: loop exit
PB: predicated region body
PF: predicated region fallthrough
CT: control target
= control target key end

     0   :  { %8 = vsyncpa [#allocation3], 0  ;;  %s320_s0 = inlined_call_operand.vmem [shape: bf16[8,128], index: 0, kind: input, shape index: {}]   ;;  %s321_s1 = inlined_call_operand.hbm [shape: bf16[128,128], index: 1, kind: input, shape index: {}]   ;;  %s322_s2 = inlined_call_operand.hbm [shape: f32[1,128], index: 2, kind: input, shape index: {}]   ;;  %s323_s3 = inlined_call_operand.vmem [shape: bf16[8,128], index: 3, kind: output, shape index: {}]  }
   0x1   :  { %9 = vsyncpa [#allocation5], 0  ;;  %s264_s12 = smov [#allocation2]   ;;  %s216_s16 = scalar_lea.hbm %s321_s1, 1024 }
   0x2   :  { %s17_s13 = sshll.u32 %s264_s12, 4  ;;  %p217_p0 = scmp.ne.s32.totalorder %s321_s1, %s216_s16  ;;  %s18_s13 = int_to_ptr.vmem [resolvable:$true] %s17_s13 }
   0x3   :  { %p220_p1 = scmp.lt.u32.totalorder %s216_s16, %s321_s1 }
   0x5   :  { %p222_p2 = pnand %p220_p1, %p217_p0 }
   0x7   :  { %225 = shalt.err (!%p222_p2)
}
   0x8   :  { %s226_s21 = scalar_lea.vmem %s18_s13, 1024  ;;  %p231_p4 = scmp.lt.s32.totalorder %s18_s13, %s18_s13 }
   0x9   :  { %p227_p3 = scmp.ne.s32.totalorder %s18_s13, %s226_s21  ;;  %p232_p5 = scmp.lt.s32.totalorder %s226_s21, %s226_s21 }
   0xb   :  { %p233_p6 = por %p232_p5, %p231_p4 }
   0xd   :  { %p234_p7 = pnand %p233_p6, %p227_p3 }
   0xf   :  { %237 = shalt.err (!%p234_p7)
}
  0x10   :  { %s265_s22 = smov 64   ;;  %s266_s23 = smov 4  }
  0x11   :  { %23 = dma.hbm_to_vmem [thread:$0]  %s321_s1, 1024, %s18_s13, [#allocation3], %s265_s22, %s265_s22, %s266_s23  }
  0x12   :  { %s267_s26 = smov [#allocation4]   ;;  %s238_s30 = scalar_lea.hbm %s322_s2, 16 }
  0x13   :  { %s30_s27 = sshll.u32 %s267_s26, 4  ;;  %p239_p8 = scmp.ne.s32.totalorder %s322_s2, %s238_s30  ;;  %s31_s27 = int_to_ptr.vmem [resolvable:$true] %s30_s27 }
  0x14   :  { %p242_p9 = scmp.lt.u32.totalorder %s238_s30, %s322_s2 }
  0x16   :  { %p244_p10 = pnand %p242_p9, %p239_p8 }
  0x18   :  { %247 = shalt.err (!%p244_p10)
}
  0x19   :  { %s248_s8 = scalar_lea.vmem %s31_s27, 16  ;;  %s252_s1 = scalar_lea.vmem %s31_s27, 32 }
  0x1a   :  { %p249_p11 = scmp.ne.s32.totalorder %s31_s27, %s248_s8  ;;  %p253_p12 = scmp.lt.s32.totalorder %s31_s27, %s31_s27 }
  0x1b   :  { %p254_p13 = scmp.lt.s32.totalorder %s252_s1, %s248_s8 }
  0x1d   :  { %p255_p0 = por %p254_p13, %p253_p12 }
  0x1f   :  { %p256_p1 = pnand %p255_p0, %p249_p11 }
  0x21   :  { %259 = shalt.err (!%p256_p1)
}
  0x22   :  { %33 = dma.hbm_to_vmem [thread:$0]  %s322_s2, 16, %s31_s27, [#allocation5]  }
  0x23   :  { %260 = dma.done.wait [#allocation3], 1024  }
  0x24   :  { %261 = vsyncadd [#allocation3], 4294966272 }
  0x25   :  { %262 = dma.done.wait [#allocation5], 16  }
  0x26   :  { %263 = vsyncadd [#allocation5], 4294967280  ;;  %v268_v0 = vmov 0.0   ;;  %vm269_vm0 = vmmov 0   ;;  %v208_v1 = vld [vmem:[#allocation2] sm:$0xff]   ;;  %v209_v2 = vld [vmem:[#allocation2 + $0x8] sm:$0xff]  }
  0x27   :  { %182 = vmatprep.subr.bf16.mxu0 %v268_v0  ;;  %198 = vmatprep.mubr.msk.bf16.mxu0 %vm269_vm0, %v268_v0  ;;  %v210_v3 = vld [vmem:[#allocation2 + $0x10] sm:$0xff]   ;;  %v211_v4 = vld [vmem:[#allocation2 + $0x18] sm:$0xff]   ;;  %v212_v5 = vld [vmem:[#allocation2 + $0x20] sm:$0xff]  }
  0x28   :  { %183 = vmatpush3.bf16.msra.mxu0 %v208_v1  ;;  %v213_v6 = vld [vmem:[#allocation2 + $0x28] sm:$0xff]   ;;  %v214_v7 = vld [vmem:[#allocation2 + $0x30] sm:$0xff]   ;;  %v215_v8 = vld [vmem:[#allocation2 + $0x38] sm:$0xff]  }
  0x29   :  { %184 = vmatprep.subr.bf16.mxu0 %v268_v0  ;;  %v41_v9 = vld [vmem:[%s320_s0] sm:$0xf] }
  0x2a   :  { %v164_v10 = vld [vmem:[#allocation4] ss:$0 sm:$0xff] }
  0x2c   :  { %185 = vmatpush3.bf16.msra.mxu0 %v209_v2 }
  0x2d   :  { %186 = vmatprep.subr.bf16.mxu0 %v268_v0 }
  0x30   :  { %187 = vmatpush3.bf16.msra.mxu0 %v210_v3 }
  0x31   :  { %188 = vmatprep.subr.bf16.mxu0 %v268_v0 }
  0x34   :  { %189 = vmatpush3.bf16.msra.mxu0 %v211_v4 }
  0x35   :  { %190 = vmatprep.subr.bf16.mxu0 %v268_v0 }
  0x38   :  { %191 = vmatpush3.bf16.msra.mxu0 %v212_v5 }
  0x39   :  { %192 = vmatprep.subr.bf16.mxu0 %v268_v0 }
  0x3c   :  { %193 = vmatpush3.bf16.msra.mxu0 %v213_v6 }
  0x3d   :  { %194 = vmatprep.subr.bf16.mxu0 %v268_v0 }
  0x40   :  { %195 = vmatpush3.bf16.msra.mxu0 %v214_v7 }
  0x41   :  { %196 = vmatprep.subr.bf16.mxu0 %v268_v0 }
  0x44   :  { %197 = vmatpush3.bf16.msra.mxu0 %v215_v8 }
  0x47   :  { %199 = vmatmul.mubr.bf16.vlgmr.msra.gmra.mrb[0].mxu0 %v41_v9 }
 0x11a   :  { %v147_v11 = vpop.f32.mrb[0].mxu0 }
 0x11b   :  { %v148_v12 = vadd.f32 %v164_v10, %v147_v11  ;;  %v200_v13 = vpop.f32.mrb[1].mxu0 }
 0x11c   :  { %v150_v14 = vpop.f32.mrb[2].mxu0 }
 0x11d   :  { %vm153_vm1 = vcmp.gt.f32.partialorder %v148_v12, 0.0  ;;  %v154_v15 = vmul.f32 0.2, %v148_v12  ;;  %v201_v16 = vpop.f32.mrb[3].mxu0 }
 0x11f   :  { %v155_v17 = vsel %vm153_vm1, %v148_v12, %v154_v15 }
 0x120   :  { %v156_v18 = vpack.c.bf16 %v155_v17, %v155_v17 }
 0x122   :  { %157 = vst [vmem:[%s323_s3] sm:$0xf] %v156_v18 }
 0x123   :  { %162 = vsyncpa [#allocation3], 1 }
 0x124   :  { %163 = vsyncpa [#allocation5], 1 }

// kernel: generator_forward.6
= control target key start
LH: loop header
LB: loop body
LE: loop exit
PB: predicated region body
PF: predicated region fallthrough
CT: control target
= control target key end

     0   :  { %10 = vsyncpa [#allocation3], 0  ;;  %s482_s0 = inlined_call_operand.vmem [shape: bf16[8,128], index: 0, kind: input, shape index: {}]   ;;  %s483_s1 = inlined_call_operand.hbm [shape: bf16[128,128], index: 1, kind: input, shape index: {}]   ;;  %s484_s2 = inlined_call_operand.hbm [shape: f32[1,128], index: 2, kind: input, shape index: {}]   ;;  %s485_s3 = inlined_call_operand.hbm [shape: f32[1,128], index: 3, kind: input, shape index: {}]   ;;  %s486_s4 = inlined_call_operand.hbm [shape: f32[1,128], index: 4, kind: input, shape index: {}]   ;;  %s487_s5 = inlined_call_operand.vmem [shape: bf16[8,128], index: 5, kind: output, shape index: {}]  }
   0x1   :  { %11 = vsyncpa [#allocation5], 0 }
   0x2   :  { %12 = vsyncpa [#allocation8], 0  ;;  %s383_s18 = smov [#allocation4]   ;;  %s384_s20 = smov [#allocation2]  }
   0x3   :  { %s33_s19 = sshll.u32 %s383_s18, 4  ;;  %s20_s21 = sshll.u32 %s384_s20, 4  ;;  %s34_s19 = int_to_ptr.vmem [resolvable:$true] %s33_s19  ;;  %s421_s21 = int_to_ptr.vmem [resolvable:$true] %s20_s21 }
   0x4   :  { %s289_s24 = scalar_lea.hbm %s484_s2, 16 }
   0x5   :  { %p290_p0 = scmp.ne.s32.totalorder %s484_s2, %s289_s24  ;;  %p293_p1 = scmp.lt.u32.totalorder %s289_s24, %s484_s2 }
   0x7   :  { %p295_p2 = pnand %p293_p1, %p290_p0 }
   0x9   :  { %298 = shalt.err (!%p295_p2)
}
   0xa   :  { %s299_s29 = scalar_lea.vmem %s34_s19, 16  ;;  %s303_s30 = scalar_lea.vmem %s34_s19, 32 }
   0xb   :  { %p300_p3 = scmp.ne.s32.totalorder %s34_s19, %s299_s29  ;;  %p304_p4 = scmp.lt.s32.totalorder %s34_s19, %s34_s19 }
   0xc   :  { %p305_p5 = scmp.lt.s32.totalorder %s303_s30, %s299_s29 }
   0xe   :  { %p306_p6 = por %p305_p5, %p304_p4 }
  0x10   :  { %p307_p7 = pnand %p306_p6, %p300_p3 }
  0x12   :  { %310 = shalt.err (!%p307_p7)
}
  0x13   :  { %36 = dma.hbm_to_vmem [thread:$0]  %s484_s2, 16, %s34_s19, [#allocation5]  }
  0x14   :  { %s311_s10 = scalar_lea.hbm %s483_s1, 1024 }
  0x15   :  { %p312_p8 = scmp.ne.s32.totalorder %s483_s1, %s311_s10  ;;  %p315_p9 = scmp.lt.u32.totalorder %s311_s10, %s483_s1 }
  0x17   :  { %p317_p10 = pnand %p315_p9, %p312_p8 }
  0x19   :  { %320 = shalt.err (!%p317_p10)
}
  0x1a   :  { %s321_s15 = scalar_lea.vmem %s421_s21, 1024  ;;  %p326_p12 = scmp.lt.s32.totalorder %s421_s21, %s421_s21 }
  0x1b   :  { %p322_p11 = scmp.ne.s32.totalorder %s421_s21, %s321_s15  ;;  %p327_p13 = scmp.lt.s32.totalorder %s321_s15, %s321_s15 }
  0x1d   :  { %p328_p0 = por %p327_p13, %p326_p12 }
  0x1f   :  { %p329_p1 = pnand %p328_p0, %p322_p11 }
  0x21   :  { %332 = shalt.err (!%p329_p1)
}
  0x22   :  { %s385_s2 = smov 64   ;;  %s386_s16 = smov 4  }
  0x23   :  { %26 = dma.hbm_to_vmem [thread:$0]  %s483_s1, 1024, %s421_s21, [#allocation3], %s385_s2, %s385_s2, %s386_s16  }
  0x24   :  { %s387_s19 = smov [#allocation6]   ;;  %s388_s22 = smov [#allocation7]  }
  0x25   :  { %s43_s20 = sshll.u32 %s387_s19, 4  ;;  %s53_s23 = sshll.u32 %s388_s22, 4  ;;  %s44_s20 = int_to_ptr.vmem [resolvable:$true] %s43_s20  ;;  %s54_s23 = int_to_ptr.vmem [resolvable:$true] %s53_s23 }
  0x26   :  { %s333_s26 = scalar_lea.hbm %s485_s3, 16 }
  0x27   :  { %p334_p2 = scmp.ne.s32.totalorder %s485_s3, %s333_s26  ;;  %p337_p3 = scmp.lt.u32.totalorder %s333_s26, %s485_s3 }
  0x29   :  { %p339_p4 = pnand %p337_p3, %p334_p2 }
  0x2b   :  { %342 = shalt.err (!%p339_p4)
}
  0x2c   :  { %s343_s1 = scalar_lea.vmem %s44_s20, 16  ;;  %s347_s21 = scalar_lea.vmem %s44_s20, 32 }
  0x2d   :  { %p344_p5 = scmp.ne.s32.totalorder %s44_s20, %s343_s1  ;;  %p348_p6 = scmp.lt.s32.totalorder %s44_s20, %s44_s20 }
  0x2e   :  { %p349_p7 = scmp.lt.s32.totalorder %s347_s21, %s343_s1 }
  0x30   :  { %p350_p8 = por %p349_p7, %p348_p6 }
  0x32   :  { %p351_p9 = pnand %p350_p8, %p344_p5 }
  0x34   :  { %354 = shalt.err (!%p351_p9)
}
  0x35   :  { %46 = dma.hbm_to_vmem [thread:$0]  %s485_s3, 16, %s44_s20, [#allocation5]  }
  0x36   :  { %s355_s10 = scalar_lea.hbm %s486_s4, 16 }
  0x37   :  { %p356_p10 = scmp.ne.s32.totalorder %s486_s4, %s355_s10  ;;  %p359_p11 = scmp.lt.u32.totalorder %s355_s10, %s486_s4 }
  0x39   :  { %p361_p12 = pnand %p359_p11, %p356_p10 }
  0x3b   :  { %364 = shalt.err (!%p361_p12)
}
  0x3c   :  { %s365_s15 = scalar_lea.vmem %s54_s23, 16  ;;  %s369_s2 = scalar_lea.vmem %s54_s23, 32 }
  0x3d   :  { %p366_p13 = scmp.ne.s32.totalorder %s54_s23, %s365_s15  ;;  %p370_p0 = scmp.lt.s32.totalorder %s54_s23, %s54_s23 }
  0x3e   :  { %p371_p1 = scmp.lt.s32.totalorder %s369_s2, %s365_s15 }
  0x40   :  { %p372_p2 = por %p371_p1, %p370_p0 }
  0x42   :  { %p373_p3 = pnand %p372_p2, %p366_p13 }
  0x44   :  { %376 = shalt.err (!%p373_p3)
}
  0x45   :  { %56 = dma.hbm_to_vmem [thread:$0]  %s486_s4, 16, %s54_s23, [#allocation8]  }
  0x46   :  { %377 = dma.done.wait [#allocation3], 1024  }
  0x47   :  { %378 = vsyncadd [#allocation3], 4294966272 }
  0x48   :  { %379 = dma.done.wait [#allocation5], 32  }
  0x49   :  { %380 = vsyncadd [#allocation5], 4294967264 }
  0x4a   :  { %381 = dma.done.wait [#allocation8], 16  }
  0x4b   :  { %382 = vsyncadd [#allocation8], 4294967280  ;;  %v389_v0 = vmov 0.0   ;;  %vm390_vm0 = vmmov 0   ;;  %v279_v1 = vld [vmem:[#allocation2] sm:$0xff]   ;;  %v280_v2 = vld [vmem:[#allocation2 + $0x8] sm:$0xff]   ;;  %v208_v34 = vlaneseq }
  0x4c   :  { %251 = vmatprep.subr.bf16.mxu0 %v389_v0  ;;  %267 = vmatprep.mubr.msk.bf16.mxu0 %vm390_vm0, %v389_v0  ;;  %v281_v3 = vld [vmem:[#allocation2 + $0x10] sm:$0xff]   ;;  %v282_v4 = vld [vmem:[#allocation2 + $0x18] sm:$0xff]   ;;  %v283_v5 = vld [vmem:[#allocation2 + $0x20] sm:$0xff]  }
  0x4d   :  { %252 = vmatpush3.bf16.msra.mxu0 %v279_v1  ;;  %v284_v6 = vld [vmem:[#allocation2 + $0x28] sm:$0xff]   ;;  %v285_v7 = vld [vmem:[#allocation2 + $0x30] sm:$0xff]   ;;  %v286_v8 = vld [vmem:[#allocation2 + $0x38] sm:$0xff]   ;;  %v209_v35 = vshrl.u32 %v208_v34, 7 }
  0x4e   :  { %253 = vmatprep.subr.bf16.mxu0 %v389_v0  ;;  %v70_v9 = vld [vmem:[%s482_s0] sm:$0xf]  ;;  %v204_v40 = vld [vmem:[#allocation7] sm:$0x1] }
  0x4f   :  { %v233_v10 = vld [vmem:[#allocation4] ss:$0 sm:$0xff]  ;;  %v200_v36 = vld [vmem:[#allocation6] sm:$0x1]  ;;  %v210_v37 = vsub.s32 0, %v209_v35 }
  0x51   :  { %254 = vmatpush3.bf16.msra.mxu0 %v280_v2 }
  0x52   :  { %255 = vmatprep.subr.bf16.mxu0 %v389_v0 }
  0x55   :  { %256 = vmatpush3.bf16.msra.mxu0 %v281_v3 }
  0x56   :  { %257 = vmatprep.subr.bf16.mxu0 %v389_v0 }
  0x59   :  { %258 = vmatpush3.bf16.msra.mxu0 %v282_v4 }
  0x5a   :  { %259 = vmatprep.subr.bf16.mxu0 %v389_v0 }
  0x5d   :  { %260 = vmatpush3.bf16.msra.mxu0 %v283_v5 }
  0x5e   :  { %261 = vmatprep.subr.bf16.mxu0 %v389_v0 }
  0x61   :  { %262 = vmatpush3.bf16.msra.mxu0 %v284_v6 }
  0x62   :  { %263 = vmatprep.subr.bf16.mxu0 %v389_v0 }
  0x65   :  { %264 = vmatpush3.bf16.msra.mxu0 %v285_v7 }
  0x66   :  { %265 = vmatprep.subr.bf16.mxu0 %v389_v0 }
  0x69   :  { %266 = vmatpush3.bf16.msra.mxu0 %v286_v8 }
  0x6c   :  { %268 = vmatmul.mubr.bf16.vlgmr.msra.gmra.mrb[0].mxu0 %v70_v9 }
 0x13f   :  { %v176_v11 = vpop.f32.mrb[0].mxu0 }
 0x140   :  { %v177_v12 = vadd.f32 %v233_v10, %v176_v11  ;;  %v269_v13 = vpop.f32.mrb[1].mxu0 }
 0x141   :  { %v179_v14 = vpop.f32.mrb[2].mxu0 }
 0x142   :  { %v182_v15 = vrot.slane %v177_v12, 4  ;;  %v190_v16 = vmul.f32 %v177_v12, %v177_v12  ;;  %v270_v17 = vpop.f32.mrb[3].mxu0 }
 0x144   :  { %v183_v18 = vadd.f32 %v182_v15, %v177_v12  ;;  %v191_v19 = vrot.slane %v190_v16, 4 }
 0x146   :  { %v184_v20 = vrot.slane %v183_v18, 2  ;;  %v192_v21 = vadd.f32 %v191_v19, %v190_v16 }
 0x148   :  { %v185_v22 = vadd.f32 %v184_v20, %v183_v18  ;;  %v193_v23 = vrot.slane %v192_v21, 2 }
 0x14a   :  { %v186_v24 = vrot.slane %v185_v22, 1  ;;  %v194_v25 = vadd.f32 %v193_v23, %v192_v21 }
 0x14c   :  { %v187_v26 = vadd.f32 %v186_v24, %v185_v22  ;;  %v195_v27 = vrot.slane %v194_v25, 1 }
 0x14e   :  { %v189_v28 = vmul.f32 0.125, %v187_v26  ;;  %v196_v29 = vadd.f32 %v195_v27, %v194_v25 }
 0x150   :  { %v197_v30 = vmul.f32 0.125, %v196_v29  ;;  %v198_v31 = vmul.f32 %v189_v28, %v189_v28 }
 0x152   :  { %v199_v32 = vsub.f32 %v197_v30, %v198_v31 }
 0x154   :  { %v201_v33 = vadd.f32 0.8, %v199_v32 }
 0x156   :  { %287 = vrsqrt.f32 %v201_v33 }
 0x160   :  { %v288_v38 = vpop.eup %287 }
 0x161   :  { %v203_v39 = vmul.f32 %v288_v38, %v200_v36 }
 0x163   :  { %v205_v41 = vmul.f32 %v203_v39, %v189_v28  ;;  %v211_v42 = vrot.slane %v203_v39, %v210_v37 }
 0x165   :  { %v206_v43 = vsub.f32 %v204_v40, %v205_v41  ;;  %v213_v44 = vmul.f32 %v211_v42, %v177_v12 }
 0x167   :  { %v218_v45 = vrot.slane %v206_v43, %v210_v37 }
 0x169   :  { %v220_v46 = vadd.f32 %v218_v45, %v213_v44 }
 0x16b   :  { %vm221_vm1 = vcmp.gt.f32.partialorder %v220_v46, 0.0  ;;  %v222_v47 = vmul.f32 0.2, %v220_v46 }
 0x16d   :  { %v223_v48 = vsel %vm221_vm1, %v220_v46, %v222_v47 }
 0x16e   :  { %v224_v49 = vpack.c.bf16 %v223_v48, %v223_v48 }
 0x170   :  { %225 = vst [vmem:[%s487_s5] sm:$0xf] %v224_v49 }
 0x171   :  { %230 = vsyncpa [#allocation3], 1 }
 0x172   :  { %231 = vsyncpa [#allocation5], 1 }
 0x173   :  { %232 = vsyncpa [#allocation8], 1 }

// kernel: generator_forward.9
= control target key start
LH: loop header
LB: loop body
LE: loop exit
PB: predicated region body
PF: predicated region fallthrough
CT: control target
= control target key end

     0   :  { %v49_v35 = vlaneseq  ;;  %s491_s1 = inlined_call_operand.vmem [shape: bf16[256,256], index: 1, kind: input, shape index: {}]   ;;  %s492_s0 = inlined_call_operand.vmem [shape: bf16[8,256], index: 0, kind: input, shape index: {}]   ;;  %s493_s2 = inlined_call_operand.vmem [shape: f32[1,256], index: 2, kind: input, shape index: {}]   ;;  %s494_s3 = inlined_call_operand.vmem [shape: f32[8,256], index: 3, kind: output, shape index: {}]  }
   0x1   :  { %v309_v0 = vld [vmem:[%s491_s1 + $0x4] ss:$8 sps:$4 sm:$0xff]   ;;  %v311_v1 = vld [vmem:[%s491_s1] ss:$8 sps:$4 sm:$0xff]   ;;  %v312_v2 = vld [vmem:[%s491_s1 + $0x14] ss:$8 sps:$4 sm:$0xff]  }
   0x2   :  { %226 = vmatprep.subr.bf16.mxu0 %v309_v0  ;;  %v314_v3 = vld [vmem:[%s491_s1 + $0x10] ss:$8 sps:$4 sm:$0xff]   ;;  %v315_v4 = vld [vmem:[%s491_s1 + $0x24] ss:$8 sps:$4 sm:$0xff]   ;;  %v317_v5 = vld [vmem:[%s491_s1 + $0x20] ss:$8 sps:$4 sm:$0xff]  }
   0x3   :  { %227 = vmatpush1.bf16.msra.mxu0 %v311_v1  ;;  %v318_v6 = vld [vmem:[%s491_s1 + $0x34] ss:$8 sps:$4 sm:$0xff]   ;;  %v320_v7 = vld [vmem:[%s491_s1 + $0x30] ss:$8 sps:$4 sm:$0xff]   ;;  %v321_v8 = vld [vmem:[%s491_s1 + $0x44] ss:$8 sps:$4 sm:$0xff]  }
   0x4   :  { %228 = vmatprep.subr.bf16.mxu0 %v312_v2  ;;  %v323_v9 = vld [vmem:[%s491_s1 + $0x40] ss:$8 sps:$4 sm:$0xff]   ;;  %v324_v10 = vld [vmem:[%s491_s1 + $0x54] ss:$8 sps:$4 sm:$0xff]   ;;  %v326_v11 = vld [vmem:[%s491_s1 + $0x50] ss:$8 sps:$4 sm:$0xff]  }
   0x5   :  { %v327_v12 = vld [vmem:[%s491_s1 + $0x64] ss:$8 sps:$4 sm:$0xff]   ;;  %v329_v15 = vld [vmem:[%s491_s1 + $0x60] ss:$8 sps:$4 sm:$0xff]   ;;  %v330_v16 = vld [vmem:[%s491_s1 + $0x74] ss:$8 sps:$4 sm:$0xff]  }
   0x6   :  { %v14_v13 = vld [vmem:[%s492_s0] sm:$0xff]  ;;  %v332_v17 = vld [vmem:[%s491_s1 + $0x70] ss:$8 sps:$4 sm:$0xff]   ;;  %v336_v20 = vld [vmem:[%s491_s1 + $0x94] ss:$8 sps:$4 sm:$0xff]   ;;  %v50_v36 = vshrl.u32 %v49_v35, 7 }
   0x7   :  { %229 = vmatpush1.bf16.msra.mxu0 %v314_v3  ;;  %v276_v14 = vcombine.high %v14_v13, %v14_v13  ;;  %v333_v18 = vld [vmem:[%s491_s1 + $0x84] ss:$8 sps:$4 sm:$0xff]   ;;  %v335_v19 = vld [vmem:[%s491_s1 + $0x80] ss:$8 sps:$4 sm:$0xff]   ;;  %v338_v21 = vld [vmem:[%s491_s1 + $0x90] ss:$8 sps:$4 sm:$0xff]   ;;  %v275_v34 = vcombine.low %v14_v13, %v14_v13 }
   0x8   :  { %230 = vmatprep.subr.bf16.mxu0 %v315_v4  ;;  %v339_v22 = vld [vmem:[%s491_s1 + $0xa4] ss:$8 sps:$4 sm:$0xff]   ;;  %v341_v23 = vld [vmem:[%s491_s1 + $0xa0] ss:$8 sps:$4 sm:$0xff]   ;;  %v342_v24 = vld [vmem:[%s491_s1 + $0xb4] ss:$8 sps:$4 sm:$0xff]  }
   0x9   :  { %258 = vmatprep.mubr.bf16.mxu0 %v276_v14  ;;  %v344_v25 = vld [vmem:[%s491_s1 + $0xb0] ss:$8 sps:$4 sm:$0xff]   ;;  %v345_v26 = vld [vmem:[%s491_s1 + $0xc4] ss:$8 sps:$4 sm:$0xff]   ;;  %v347_v27 = vld [vmem:[%s491_s1 + $0xc0] ss:$8 sps:$4 sm:$0xff]  }
   0xa   :  { %v348_v28 = vld [vmem:[%s491_s1 + $0xd4] ss:$8 sps:$4 sm:$0xff]   ;;  %v350_v29 = vld [vmem:[%s491_s1 + $0xd0] ss:$8 sps:$4 sm:$0xff]   ;;  %v351_v30 = vld [vmem:[%s491_s1 + $0xe4] ss:$8 sps:$4 sm:$0xff]  }
   0xb   :  { %231 = vmatpush1.bf16.msra.mxu0 %v317_v5  ;;  %v353_v31 = vld [vmem:[%s491_s1 + $0xe0] ss:$8 sps:$4 sm:$0xff]   ;;  %v354_v32 = vld [vmem:[%s491_s1 + $0xf4] ss:$8 sps:$4 sm:$0xff]   ;;  %v356_v33 = vld [vmem:[%s491_s1 + $0xf0] ss:$8 sps:$4 sm:$0xff]  }
   0xc   :  { %232 = vmatprep.subr.bf16.mxu0 %v318_v6  ;;  %v51_v37 = vsub.s32 0, %v50_v36  ;;  %v47_v38 = vld [vmem:[%s493_s2] sm:$0x3]  ;;  %v55_v39 = vsub.s32 1, %v50_v36 }
   0xe   :  { %v52_v40 = vrot.slane %v47_v38, %v51_v37  ;;  %v56_v41 = vrot.slane %v47_v38, %v55_v39 }
   0xf   :  { %233 = vmatpush1.bf16.msra.mxu0 %v320_v7 }
  0x10   :  { %234 = vmatprep.subr.bf16.mxu0 %v321_v8 }
  0x13   :  { %235 = vmatpush1.bf16.msra.mxu0 %v323_v9 }
  0x14   :  { %236 = vmatprep.subr.bf16.mxu0 %v324_v10 }
  0x17   :  { %237 = vmatpush1.bf16.msra.mxu0 %v326_v11 }
  0x18   :  { %238 = vmatprep.subr.bf16.mxu0 %v327_v12 }
  0x1b   :  { %239 = vmatpush1.bf16.msra.mxu0 %v329_v15 }
  0x1c   :  { %240 = vmatprep.subr.bf16.mxu0 %v330_v16 }
  0x1f   :  { %241 = vmatpush1.bf16.msra.mxu0 %v332_v17 }
  0x20   :  { %242 = vmatprep.subr.bf16.mxu0 %v333_v18 }
  0x23   :  { %243 = vmatpush1.bf16.msra.mxu0 %v335_v19 }
  0x24   :  { %244 = vmatprep.subr.bf16.mxu0 %v336_v20 }
  0x27   :  { %245 = vmatpush1.bf16.msra.mxu0 %v338_v21 }
  0x28   :  { %246 = vmatprep.subr.bf16.mxu0 %v339_v22 }
  0x2b   :  { %247 = vmatpush1.bf16.msra.mxu0 %v341_v23 }
  0x2c   :  { %248 = vmatprep.subr.bf16.mxu0 %v342_v24 }
  0x2f   :  { %249 = vmatpush1.bf16.msra.mxu0 %v344_v25 }
  0x30   :  { %250 = vmatprep.subr.bf16.mxu0 %v345_v26 }
  0x33   :  { %251 = vmatpush1.bf16.msra.mxu0 %v347_v27 }
  0x34   :  { %252 = vmatprep.subr.bf16.mxu0 %v348_v28 }
  0x37   :  { %253 = vmatpush1.bf16.msra.mxu0 %v350_v29 }
  0x38   :  { %254 = vmatprep.subr.bf16.mxu0 %v351_v30 }
  0x3b   :  { %255 = vmatpush1.bf16.msra.mxu0 %v353_v31 }
  0x3c   :  { %256 = vmatprep.subr.bf16.mxu0 %v354_v32 }
  0x3f   :  { %257 = vmatpush1.bf16.msra.mxu0 %v356_v33 }
  0x42   :  { %259 = vmatmul.mubr.bf16.vlgmr.msra.gmra.mrb[0].mxu0 %v275_v34 }
 0x115   :  { %v260_v42 = vpop.f32.mrb[0].mxu0 }
 0x116   :  { %v261_v43 = vadd.f32 %v260_v42, %v52_v40  ;;  %v262_v44 = vpop.f32.mrb[1].mxu0 }
 0x117   :  { %v263_v45 = vadd.f32 %v262_v44, %v56_v41  ;;  %v264_v46 = vpop.f32.mrb[2].mxu0 }
 0x118   :  { %359 = vtanh.f32 %v261_v43  ;;  %v265_v47 = vpop.f32.mrb[3].mxu0 }
 0x119   :  { %361 = vtanh.f32 %v263_v45 }
 0x122   :  { %v360_v48 = vpop.eup %359 }
 0x123   :  { %v362_v49 = vpop.eup %361  ;;  %269 = vst [vmem:[%s494_s3] sm:$0xff] %v360_v48 }
 0x124   :  { %270 = vst [vmem:[%s494_s3 + $0x8] sm:$0xff] %v362_v49 }

// kernel: generator_forward.8
= control target key start
LH: loop header
LB: loop body
LE: loop exit
PB: predicated region body
PF: predicated region fallthrough
CT: control target
= control target key end

     0   :  { %10 = vsyncpa [#allocation3], 0  ;;  %s387_s18 = smov [#allocation2]   ;;  %s459_s0 = inlined_call_operand.vmem [shape: bf16[8,128], index: 0, kind: input, shape index: {}]   ;;  %s460_s1 = inlined_call_operand.hbm [shape: bf16[128,256], index: 1, kind: input, shape index: {}]   ;;  %s461_s2 = inlined_call_operand.vmem [shape: f32[1,256], index: 2, kind: input, shape index: {}]   ;;  %s462_s3 = inlined_call_operand.vmem [shape: f32[1,256], index: 3, kind: input, shape index: {}]   ;;  %s463_s4 = inlined_call_operand.vmem [shape: f32[1,256], index: 4, kind: input, shape index: {}]   ;;  %s464_s5 = inlined_call_operand.vmem [shape: bf16[8,256], index: 5, kind: output, shape index: {}]  }
   0x1   :  { %s18_s19 = sshll.u32 %s387_s18, 4  ;;  %s363_s22 = scalar_lea.hbm %s460_s1, 2048  ;;  %s19_s19 = int_to_ptr.vmem [resolvable:$true] %s18_s19 }
   0x2   :  { %p364_p0 = scmp.ne.s32.totalorder %s460_s1, %s363_s22  ;;  %p367_p1 = scmp.lt.u32.totalorder %s363_s22, %s460_s1 }
   0x4   :  { %p369_p2 = pnand %p367_p1, %p364_p0 }
   0x6   :  { %372 = shalt.err (!%p369_p2)
}
   0x7   :  { %s373_s27 = scalar_lea.vmem %s19_s19, 2048  ;;  %p378_p4 = scmp.lt.s32.totalorder %s19_s19, %s19_s19 }
   0x8   :  { %p374_p3 = scmp.ne.s32.totalorder %s19_s19, %s373_s27  ;;  %p379_p5 = scmp.lt.s32.totalorder %s373_s27, %s373_s27 }
   0xa   :  { %p380_p6 = por %p379_p5, %p378_p4 }
   0xc   :  { %p381_p7 = pnand %p380_p6, %p374_p3 }
   0xe   :  { %384 = shalt.err (!%p381_p7)
}
   0xf   :  { %s388_s28 = smov 128   ;;  %s389_s29 = smov 8  }
  0x10   :  { %24 = dma.hbm_to_vmem [thread:$0]  %s460_s1, 2048, %s19_s19, [#allocation3], %s388_s28, %s388_s28, %s389_s29  }
  0x11   :  { %385 = dma.done.wait [#allocation3], 2048  }
  0x12   :  { %386 = vsyncadd [#allocation3], 4294965248  ;;  %v390_v0 = vmov 0   ;;  %v335_v1 = vld [vmem:[#allocation2 + $0x4] ss:$8 sps:$4 sm:$0xff]   ;;  %v54_v18 = vlaneseq }
  0x13   :  { %176 = vmatprep.mubr.bf16.mxu0 %v390_v0  ;;  %v337_v2 = vld [vmem:[#allocation2] ss:$8 sps:$4 sm:$0xff]   ;;  %144 = vmatprep.subr.bf16.mxu0 %v335_v1  ;;  %v338_v3 = vld [vmem:[#allocation2 + $0x14] ss:$8 sps:$4 sm:$0xff]   ;;  %v340_v4 = vld [vmem:[#allocation2 + $0x10] ss:$8 sps:$4 sm:$0xff]  }
  0x14   :  { %145 = vmatpush1.bf16.msra.mxu0 %v337_v2  ;;  %v341_v5 = vld [vmem:[#allocation2 + $0x24] ss:$8 sps:$4 sm:$0xff]   ;;  %v343_v6 = vld [vmem:[#allocation2 + $0x20] ss:$8 sps:$4 sm:$0xff]   ;;  %v344_v7 = vld [vmem:[#allocation2 + $0x34] ss:$8 sps:$4 sm:$0xff]  }
  0x15   :  { %146 = vmatprep.subr.bf16.mxu0 %v338_v3  ;;  %v346_v8 = vld [vmem:[#allocation2 + $0x30] ss:$8 sps:$4 sm:$0xff]   ;;  %v347_v9 = vld [vmem:[#allocation2 + $0x44] ss:$8 sps:$4 sm:$0xff]   ;;  %v349_v10 = vld [vmem:[#allocation2 + $0x40] ss:$8 sps:$4 sm:$0xff]  }
  0x16   :  { %v350_v11 = vld [vmem:[#allocation2 + $0x54] ss:$8 sps:$4 sm:$0xff]   ;;  %v352_v12 = vld [vmem:[#allocation2 + $0x50] ss:$8 sps:$4 sm:$0xff]   ;;  %v353_v13 = vld [vmem:[#allocation2 + $0x64] ss:$8 sps:$4 sm:$0xff]  }
  0x17   :  { %v355_v14 = vld [vmem:[#allocation2 + $0x60] ss:$8 sps:$4 sm:$0xff]   ;;  %v356_v15 = vld [vmem:[#allocation2 + $0x74] ss:$8 sps:$4 sm:$0xff]   ;;  %v358_v16 = vld [vmem:[#allocation2 + $0x70] ss:$8 sps:$4 sm:$0xff]  }
  0x18   :  { %147 = vmatpush1.bf16.msra.mxu0 %v340_v4  ;;  %v35_v17 = vld [vmem:[%s459_s0] sm:$0xf]  ;;  %v55_v19 = vshrl.u32 %v54_v18, 7  ;;  %v391_v3 = vmov 1966171168  }
  0x19   :  { %148 = vmatprep.subr.bf16.mxu0 %v341_v5  ;;  %v52_v21 = vld [vmem:[%s461_s2] sm:$0x3]  ;;  %v229_v4 = vunpack.c.l.s4 %v391_v3 }
  0x1a   :  { %v437_v20 = vsub.s32 0, %v55_v19  ;;  %v442_v22 = vsub.s32 1, %v55_v19 }
  0x1b   :  { %v230_v5 = vunpack.c.0.s8 %v229_v4 }
  0x1c   :  { %149 = vmatpush1.bf16.msra.mxu0 %v343_v6  ;;  %v57_v23 = vrot.slane %v52_v21, %v437_v20  ;;  %v61_v24 = vrot.slane %v52_v21, %v442_v22 }
  0x1d   :  { %150 = vmatprep.subr.bf16.mxu0 %v344_v7  ;;  %v233_v7 = vsub.s32 %v230_v5, %v55_v19  ;;  %v244_v19 = vld [vmem:[%s463_s4] sm:$0x3] }
  0x20   :  { %151 = vmatpush1.bf16.msra.mxu0 %v346_v8 }
  0x21   :  { %152 = vmatprep.subr.bf16.mxu0 %v347_v9 }
  0x24   :  { %153 = vmatpush1.bf16.msra.mxu0 %v349_v10 }
  0x25   :  { %154 = vmatprep.subr.bf16.mxu0 %v350_v11  ;;  %v220_v11 = vld [vmem:[%s462_s3] sm:$0x3] }
  0x28   :  { %155 = vmatpush1.bf16.msra.mxu0 %v352_v12 }
  0x29   :  { %156 = vmatprep.subr.bf16.mxu0 %v353_v13 }
  0x2c   :  { %157 = vmatpush1.bf16.msra.mxu0 %v355_v14 }
  0x2d   :  { %158 = vmatprep.subr.bf16.mxu0 %v356_v15 }
  0x30   :  { %159 = vmatpush1.bf16.msra.mxu0 %v358_v16 }
  0x33   :  { %177 = vmatmul.mubr.bf16.vlgmr.msra.gmra.mrb[0].mxu0 %v35_v17 }
 0x106   :  { %v178_v25 = vpop.f32.mrb[0].mxu0 }
 0x107   :  { %v179_v26 = vadd.f32 %v178_v25, %v57_v23  ;;  %v180_v27 = vpop.f32.mrb[1].mxu0 }
 0x108   :  { %v181_v28 = vadd.f32 %v180_v27, %v61_v24  ;;  %v182_v29 = vpop.f32.mrb[2].mxu0 }
 0x109   :  { %v185_v30 = vrot.slane %v179_v26, 4  ;;  %v200_v31 = vmul.f32 %v179_v26, %v179_v26  ;;  %v183_v32 = vpop.f32.mrb[3].mxu0 }
 0x10a   :  { %v191_v33 = vrot.slane %v181_v28, 4  ;;  %v201_v34 = vmul.f32 %v181_v28, %v181_v28 }
 0x10b   :  { %v186_v35 = vadd.f32 %v185_v30, %v179_v26  ;;  %v202_v36 = vrot.slane %v200_v31, 4 }
 0x10c   :  { %v192_v37 = vadd.f32 %v191_v33, %v181_v28  ;;  %v208_v38 = vrot.slane %v201_v34, 4 }
 0x10d   :  { %v187_v39 = vrot.slane %v186_v35, 2  ;;  %v203_v40 = vadd.f32 %v202_v36, %v200_v31 }
 0x10e   :  { %v193_v41 = vrot.slane %v192_v37, 2  ;;  %v209_v42 = vadd.f32 %v208_v38, %v201_v34 }
 0x10f   :  { %v188_v43 = vadd.f32 %v187_v39, %v186_v35  ;;  %v204_v44 = vrot.slane %v203_v40, 2 }
 0x110   :  { %v194_v45 = vadd.f32 %v193_v41, %v192_v37  ;;  %v210_v46 = vrot.slane %v209_v42, 2 }
 0x111   :  { %v189_v47 = vrot.slane %v188_v43, 1  ;;  %v205_v48 = vadd.f32 %v204_v44, %v203_v40 }
 0x112   :  { %v195_v49 = vrot.slane %v194_v45, 1  ;;  %v211_v50 = vadd.f32 %v210_v46, %v209_v42 }
 0x113   :  { %v190_v51 = vadd.f32 %v189_v47, %v188_v43  ;;  %v206_v52 = vrot.slane %v205_v48, 1 }
 0x114   :  { %v196_v53 = vadd.f32 %v195_v49, %v194_v45  ;;  %v212_v54 = vrot.slane %v211_v50, 1 }
 0x115   :  { %v198_v55 = vmul.f32 0.125, %v190_v51  ;;  %v207_v56 = vadd.f32 %v206_v52, %v205_v48 }
 0x116   :  { %v199_v57 = vmul.f32 0.125, %v196_v53  ;;  %v213_v58 = vadd.f32 %v212_v54, %v211_v50 }
 0x117   :  { %v214_v59 = vmul.f32 0.125, %v207_v56  ;;  %v216_v60 = vmul.f32 %v198_v55, %v198_v55 }
 0x118   :  { %v215_v61 = vmul.f32 0.125, %v213_v58  ;;  %v217_v62 = vmul.f32 %v199_v57, %v199_v57 }
 0x119   :  { %v218_v63 = vsub.f32 %v214_v59, %v216_v60 }
 0x11a   :  { %v219_v0 = vsub.f32 %v215_v61, %v217_v62 }
 0x11b   :  { %v221_v1 = vadd.f32 0.8, %v218_v63 }
 0x11c   :  { %v222_v2 = vadd.f32 0.8, %v219_v0 }
 0x11d   :  { %359 = vrsqrt.f32 %v221_v1 }
 0x11e   :  { %361 = vrsqrt.f32 %v222_v2 }
 0x127   :  { %v360_v6 = vpop.eup %359 }
 0x128   :  { %v362_v8 = vpop.eup %361 }
 0x129   :  { %v227_v9 = vcombine.low %v360_v6, %v362_v8 }
 0x12b   :  { %v234_v10 = vrot.slane %v227_v9, %v233_v7 }
 0x12d   :  { %v241_v12 = vrot.slane %v234_v10, %v233_v7 }
 0x12f   :  { %v243_v13 = vmul.f32 %v241_v12, %v220_v11 }
 0x131   :  { %v249_v14 = vrot.slane %v243_v13, %v437_v20  ;;  %v253_v15 = vrot.slane %v243_v13, %v442_v22 }
 0x133   :  { %v256_v16 = vmul.f32 %v249_v14, %v198_v55  ;;  %v257_v17 = vmul.f32 %v253_v15, %v199_v57  ;;  %v277_v18 = vmul.f32 %v249_v14, %v179_v26  ;;  %v278_v21 = vmul.f32 %v253_v15, %v181_v28 }
 0x135   :  { %v260_v23 = vcombine.low %v256_v16, %v257_v17 }
 0x137   :  { %v267_v24 = vrot.slane %v260_v23, %v233_v7 }
 0x139   :  { %v274_v25 = vrot.slane %v267_v24, %v233_v7 }
 0x13b   :  { %v276_v27 = vsub.f32 %v244_v19, %v274_v25 }
 0x13d   :  { %v283_v29 = vrot.slane %v276_v27, %v437_v20  ;;  %v287_v30 = vrot.slane %v276_v27, %v442_v22 }
 0x13f   :  { %v290_v31 = vadd.f32 %v283_v29, %v277_v18  ;;  %v291_v32 = vadd.f32 %v287_v30, %v278_v21 }
 0x141   :  { %vm292_vm0 = vcmp.gt.f32.partialorder %v290_v31, 0.0  ;;  %vm293_vm1 = vcmp.gt.f32.partialorder %v291_v32, 0.0  ;;  %v294_v33 = vmul.f32 0.2, %v290_v31  ;;  %v295_v34 = vmul.f32 0.2, %v291_v32 }
 0x143   :  { %v296_v26 = vsel %vm292_vm0, %v290_v31, %v294_v33  ;;  %v297_v28 = vsel %vm293_vm1, %v291_v32, %v295_v34 }
 0x144   :  { %v329_v35 = vpack.c.bf16 %v297_v28, %v296_v26 }
 0x146   :  { %306 = vst [vmem:[%s464_s5] sm:$0xff] %v329_v35 }
 0x147   :  { %311 = vsyncpa [#allocation3], 1 }

</bundles_post_ra>
